<compile_context>
chip_gen: v7x
topology: tpu7x:2x2x1
jax: 0.10.0
libtpu: 0.0.40
codegen_flags: <defaults>
</compile_context>

<pallas_src>
import jax
import jax.numpy as jnp
from jax.experimental import pallas as pl
from jax.experimental.pallas import tpu as pltpu

NUM_LAYERS = 6          # hidden Linear+BN+ReLU blocks; the output Linear+BN is layer 7
BN_EPS = 1e-5
MOMENT_EPS = 1e-8


def mapping_kernel(z_ref, w_ref, gb_ref, o_ref):
    # z_ref : (B, H)         input latents
    # w_ref : (L+1, H, H)    pre-transposed (in, out) Linear weights; slab L is `out`
    # gb_ref: (L+1, 2, H)    packed [gamma; beta] per BatchNorm
    # o_ref : (B, H)         normalized output (before the num_ws repeat)
    B = z_ref.shape[0]
    inv_b = jnp.float32(1.0 / B)

    # --- normalize 2nd moment over the feature axis ---
    x = z_ref[...].astype(jnp.float32)
    x = x * jax.lax.rsqrt(jnp.mean(x * x, axis=1, keepdims=True) + MOMENT_EPS)

    # --- 6 x (Linear -> BN(train batch stats) -> ReLU), then out Linear -> out BN ---
    # Linear biases are mathematically dead (cancel in x - mean(x)) and are omitted.
    for i in range(NUM_LAYERS + 1):          # static unrolled loop (tiny H)
        x = jnp.dot(x, w_ref[i], preferred_element_type=jnp.float32)

        # Single-pass batch stats: biased var = E[x^2] - mu^2.
        mu = jnp.sum(x, axis=0, keepdims=True) * inv_b
        ex2 = jnp.sum(x * x, axis=0, keepdims=True) * inv_b
        var = ex2 - mu * mu

        gb = gb_ref[i]                                     # (2, H) gamma/beta
        scale = gb[0:1, :] * jax.lax.rsqrt(var + BN_EPS)   # fold gamma into the scale
        x = (x - mu) * scale + gb[1:2, :]

        if i < NUM_LAYERS:                                 # no ReLU after out_bn
            x = jnp.maximum(x, 0.0)

    o_ref[...] = x


def init_params(key, z_dim, w_dim):
    assert w_dim == z_dim, "module's out_bn(z_dim) requires w_dim == z_dim"
    H = z_dim
    L = NUM_LAYERS
    # Stacked pre-transposed (in, out) weights for the 6 hidden Linears + `out` Linear.
    w = jax.random.normal(key, (L + 1, H, H), jnp.float32) * (1.0 / jnp.sqrt(H))
    # BatchNorm affine params at PyTorch init: gamma = 1, beta = 0; packed (L+1, 2, H).
    gb = jnp.concatenate(
        [jnp.ones((L + 1, 1, H), jnp.float32),
         jnp.zeros((L + 1, 1, H), jnp.float32)], axis=1)
    # NOTE: Linear biases are intentionally not materialized — a pre-BN bias cancels
    # exactly under train-mode BatchNorm, so the forward pass is unchanged.
    return dict(w=w, gb=gb)


def mapping_network(z, params, num_ws):
    B, _ = z.shape
    w_all, gb_all = params["w"], params["gb"]
    w_dim = w_all.shape[2]

    out2d = pl.pallas_call(
        mapping_kernel,
        out_shape=jax.ShapeDtypeStruct((B, w_dim), jnp.float32),
        in_specs=[
            pl.BlockSpec(z.shape, lambda *_: (0, 0)),
            pl.BlockSpec(w_all.shape, lambda *_: (0, 0, 0)),
            pl.BlockSpec(gb_all.shape, lambda *_: (0, 0, 0)),
        ],
        out_specs=pl.BlockSpec((B, w_dim), lambda *_: (0, 0)),
        compiler_params=pltpu.CompilerParams(vmem_limit_bytes=32 << 20),
    )(z, w_all, gb_all)

    # unsqueeze(1).repeat([1, num_ws, 1]) done outside the kernel as an XLA broadcast.
    return jnp.broadcast_to(out2d[:, None, :], (B, num_ws, w_dim))


if __name__ == "__main__":
    key = jax.random.PRNGKey(0)
    k_z, k_p = jax.random.split(key)

    B, Z_DIM, W_DIM, NUM_WS = 8, 32, 32, 4   # w_dim must equal z_dim (see note above)
    z = jax.random.normal(k_z, (B, Z_DIM), jnp.float32)
    params = init_params(k_p, Z_DIM, W_DIM)

    out = mapping_network(z, params, NUM_WS)
    jax.block_until_ready(out)
    assert out.shape == (B, NUM_WS, W_DIM) and out.dtype == jnp.float32
    print("KERNEL_OK")
</pallas_src>

<mosaic_0001>
module attributes {stable_mosaic.version = 11 : i64} {
  func.func @mapping_kernel(%arg0: memref<8x32xf32, #tpu.memory_space<vmem>>, %arg1: memref<7x32x32xf32, #tpu.memory_space<vmem>>, %arg2: memref<7x2x32xf32, #tpu.memory_space<vmem>>, %arg3: memref<8x32xf32, #tpu.memory_space<vmem>>) attributes {dimension_semantics = [], scalar_prefetch = 0 : i64, scratch_operands = 0 : i64, tpu.core_type = #tpu.core_type<tc>} {
    %c0 = arith.constant 0 : index
    %c0_0 = arith.constant 0 : index
    %0 = vector.load %arg0[%c0, %c0_0] : memref<8x32xf32, #tpu.memory_space<vmem>>, vector<8x32xf32>
    %1 = arith.mulf %0, %0 : vector<8x32xf32>
    %cst = arith.constant dense<0.000000e+00> : vector<8xf32>
    %2 = vector.multi_reduction <add>, %1, %cst [1] : vector<8x32xf32> to vector<8xf32>
    %3 = vector.shape_cast %2 : vector<8xf32> to vector<8x1xf32>
    %cst_1 = arith.constant 3.200000e+01 : f32
    %4 = vector.broadcast %cst_1 : f32 to vector<8x1xf32>
    %5 = arith.divf %3, %4 : vector<8x1xf32>
    %cst_2 = arith.constant 9.99999993E-9 : f32
    %6 = vector.broadcast %cst_2 : f32 to vector<8x1xf32>
    %7 = arith.addf %5, %6 : vector<8x1xf32>
    %8 = math.rsqrt %7 : vector<8x1xf32>
    %9 = vector.broadcast %8 : vector<8x1xf32> to vector<8x32xf32>
    %10 = arith.mulf %0, %9 : vector<8x32xf32>
    %c0_3 = arith.constant 0 : index
    %c0_4 = arith.constant 0 : index
    %c0_5 = arith.constant 0 : index
    %11 = vector.load %arg1[%c0_3, %c0_4, %c0_5] : memref<7x32x32xf32, #tpu.memory_space<vmem>>, vector<1x32x32xf32>
    %12 = vector.shape_cast %11 : vector<1x32x32xf32> to vector<32x32xf32>
    %cst_6 = arith.constant dense<0.000000e+00> : vector<8x32xf32>
    %13 = tpu.matmul %10, %12, %cst_6 {dimension_numbers = #tpu.dot_dimension_numbers<[1], [0], [0], [1], [0, 0, 1, 1], [], []>} : vector<8x32xf32>, vector<32x32xf32>, vector<8x32xf32> -> vector<8x32xf32>
    %cst_7 = arith.constant dense<0.000000e+00> : vector<32xf32>
    %14 = vector.multi_reduction <add>, %13, %cst_7 [0] : vector<8x32xf32> to vector<32xf32>
    %15 = vector.shape_cast %14 : vector<32xf32> to vector<1x32xf32>
    %cst_8 = arith.constant 1.250000e-01 : f32
    %16 = vector.broadcast %cst_8 : f32 to vector<1x32xf32>
    %17 = arith.mulf %15, %16 : vector<1x32xf32>
    %18 = arith.mulf %13, %13 : vector<8x32xf32>
    %cst_9 = arith.constant dense<0.000000e+00> : vector<32xf32>
    %19 = vector.multi_reduction <add>, %18, %cst_9 [0] : vector<8x32xf32> to vector<32xf32>
    %20 = vector.shape_cast %19 : vector<32xf32> to vector<1x32xf32>
    %cst_10 = arith.constant 1.250000e-01 : f32
    %21 = vector.broadcast %cst_10 : f32 to vector<1x32xf32>
    %22 = arith.mulf %20, %21 : vector<1x32xf32>
    %23 = arith.mulf %17, %17 : vector<1x32xf32>
    %24 = arith.subf %22, %23 : vector<1x32xf32>
    %c0_11 = arith.constant 0 : index
    %c0_12 = arith.constant 0 : index
    %c0_13 = arith.constant 0 : index
    %25 = vector.load %arg2[%c0_11, %c0_12, %c0_13] : memref<7x2x32xf32, #tpu.memory_space<vmem>>, vector<1x2x32xf32>
    %26 = vector.shape_cast %25 : vector<1x2x32xf32> to vector<2x32xf32>
    %27 = vector.extract_strided_slice %26 {offsets = [0, 0], sizes = [1, 32], strides = [1, 1]} : vector<2x32xf32> to vector<1x32xf32>
    %cst_14 = arith.constant 9.99999974E-6 : f32
    %28 = vector.broadcast %cst_14 : f32 to vector<1x32xf32>
    %29 = arith.addf %24, %28 : vector<1x32xf32>
    %30 = math.rsqrt %29 : vector<1x32xf32>
    %31 = arith.mulf %27, %30 : vector<1x32xf32>
    %32 = vector.broadcast %17 : vector<1x32xf32> to vector<8x32xf32>
    %33 = arith.subf %13, %32 : vector<8x32xf32>
    %34 = vector.broadcast %31 : vector<1x32xf32> to vector<8x32xf32>
    %35 = arith.mulf %33, %34 : vector<8x32xf32>
    %36 = vector.extract_strided_slice %26 {offsets = [1, 0], sizes = [1, 32], strides = [1, 1]} : vector<2x32xf32> to vector<1x32xf32>
    %37 = vector.broadcast %36 : vector<1x32xf32> to vector<8x32xf32>
    %38 = arith.addf %35, %37 : vector<8x32xf32>
    %cst_15 = arith.constant 0.000000e+00 : f32
    %39 = vector.broadcast %cst_15 : f32 to vector<8x32xf32>
    %40 = arith.maximumf %38, %39 : vector<8x32xf32>
    %c1 = arith.constant 1 : index
    %c0_16 = arith.constant 0 : index
    %c0_17 = arith.constant 0 : index
    %41 = vector.load %arg1[%c1, %c0_16, %c0_17] : memref<7x32x32xf32, #tpu.memory_space<vmem>>, vector<1x32x32xf32>
    %42 = vector.shape_cast %41 : vector<1x32x32xf32> to vector<32x32xf32>
    %cst_18 = arith.constant dense<0.000000e+00> : vector<8x32xf32>
    %43 = tpu.matmul %40, %42, %cst_18 {dimension_numbers = #tpu.dot_dimension_numbers<[1], [0], [0], [1], [0, 0, 1, 1], [], []>} : vector<8x32xf32>, vector<32x32xf32>, vector<8x32xf32> -> vector<8x32xf32>
    %cst_19 = arith.constant dense<0.000000e+00> : vector<32xf32>
    %44 = vector.multi_reduction <add>, %43, %cst_19 [0] : vector<8x32xf32> to vector<32xf32>
    %45 = vector.shape_cast %44 : vector<32xf32> to vector<1x32xf32>
    %cst_20 = arith.constant 1.250000e-01 : f32
    %46 = vector.broadcast %cst_20 : f32 to vector<1x32xf32>
    %47 = arith.mulf %45, %46 : vector<1x32xf32>
    %48 = arith.mulf %43, %43 : vector<8x32xf32>
    %cst_21 = arith.constant dense<0.000000e+00> : vector<32xf32>
    %49 = vector.multi_reduction <add>, %48, %cst_21 [0] : vector<8x32xf32> to vector<32xf32>
    %50 = vector.shape_cast %49 : vector<32xf32> to vector<1x32xf32>
    %cst_22 = arith.constant 1.250000e-01 : f32
    %51 = vector.broadcast %cst_22 : f32 to vector<1x32xf32>
    %52 = arith.mulf %50, %51 : vector<1x32xf32>
    %53 = arith.mulf %47, %47 : vector<1x32xf32>
    %54 = arith.subf %52, %53 : vector<1x32xf32>
    %c1_23 = arith.constant 1 : index
    %c0_24 = arith.constant 0 : index
    %c0_25 = arith.constant 0 : index
    %55 = vector.load %arg2[%c1_23, %c0_24, %c0_25] : memref<7x2x32xf32, #tpu.memory_space<vmem>>, vector<1x2x32xf32>
    %56 = vector.shape_cast %55 : vector<1x2x32xf32> to vector<2x32xf32>
    %57 = vector.extract_strided_slice %56 {offsets = [0, 0], sizes = [1, 32], strides = [1, 1]} : vector<2x32xf32> to vector<1x32xf32>
    %cst_26 = arith.constant 9.99999974E-6 : f32
    %58 = vector.broadcast %cst_26 : f32 to vector<1x32xf32>
    %59 = arith.addf %54, %58 : vector<1x32xf32>
    %60 = math.rsqrt %59 : vector<1x32xf32>
    %61 = arith.mulf %57, %60 : vector<1x32xf32>
    %62 = vector.broadcast %47 : vector<1x32xf32> to vector<8x32xf32>
    %63 = arith.subf %43, %62 : vector<8x32xf32>
    %64 = vector.broadcast %61 : vector<1x32xf32> to vector<8x32xf32>
    %65 = arith.mulf %63, %64 : vector<8x32xf32>
    %66 = vector.extract_strided_slice %56 {offsets = [1, 0], sizes = [1, 32], strides = [1, 1]} : vector<2x32xf32> to vector<1x32xf32>
    %67 = vector.broadcast %66 : vector<1x32xf32> to vector<8x32xf32>
    %68 = arith.addf %65, %67 : vector<8x32xf32>
    %cst_27 = arith.constant 0.000000e+00 : f32
    %69 = vector.broadcast %cst_27 : f32 to vector<8x32xf32>
    %70 = arith.maximumf %68, %69 : vector<8x32xf32>
    %c2 = arith.constant 2 : index
    %c0_28 = arith.constant 0 : index
    %c0_29 = arith.constant 0 : index
    %71 = vector.load %arg1[%c2, %c0_28, %c0_29] : memref<7x32x32xf32, #tpu.memory_space<vmem>>, vector<1x32x32xf32>
    %72 = vector.shape_cast %71 : vector<1x32x32xf32> to vector<32x32xf32>
    %cst_30 = arith.constant dense<0.000000e+00> : vector<8x32xf32>
    %73 = tpu.matmul %70, %72, %cst_30 {dimension_numbers = #tpu.dot_dimension_numbers<[1], [0], [0], [1], [0, 0, 1, 1], [], []>} : vector<8x32xf32>, vector<32x32xf32>, vector<8x32xf32> -> vector<8x32xf32>
    %cst_31 = arith.constant dense<0.000000e+00> : vector<32xf32>
    %74 = vector.multi_reduction <add>, %73, %cst_31 [0] : vector<8x32xf32> to vector<32xf32>
    %75 = vector.shape_cast %74 : vector<32xf32> to vector<1x32xf32>
    %cst_32 = arith.constant 1.250000e-01 : f32
    %76 = vector.broadcast %cst_32 : f32 to vector<1x32xf32>
    %77 = arith.mulf %75, %76 : vector<1x32xf32>
    %78 = arith.mulf %73, %73 : vector<8x32xf32>
    %cst_33 = arith.constant dense<0.000000e+00> : vector<32xf32>
    %79 = vector.multi_reduction <add>, %78, %cst_33 [0] : vector<8x32xf32> to vector<32xf32>
    %80 = vector.shape_cast %79 : vector<32xf32> to vector<1x32xf32>
    %cst_34 = arith.constant 1.250000e-01 : f32
    %81 = vector.broadcast %cst_34 : f32 to vector<1x32xf32>
    %82 = arith.mulf %80, %81 : vector<1x32xf32>
    %83 = arith.mulf %77, %77 : vector<1x32xf32>
    %84 = arith.subf %82, %83 : vector<1x32xf32>
    %c2_35 = arith.constant 2 : index
    %c0_36 = arith.constant 0 : index
    %c0_37 = arith.constant 0 : index
    %85 = vector.load %arg2[%c2_35, %c0_36, %c0_37] : memref<7x2x32xf32, #tpu.memory_space<vmem>>, vector<1x2x32xf32>
    %86 = vector.shape_cast %85 : vector<1x2x32xf32> to vector<2x32xf32>
    %87 = vector.extract_strided_slice %86 {offsets = [0, 0], sizes = [1, 32], strides = [1, 1]} : vector<2x32xf32> to vector<1x32xf32>
    %cst_38 = arith.constant 9.99999974E-6 : f32
    %88 = vector.broadcast %cst_38 : f32 to vector<1x32xf32>
    %89 = arith.addf %84, %88 : vector<1x32xf32>
    %90 = math.rsqrt %89 : vector<1x32xf32>
    %91 = arith.mulf %87, %90 : vector<1x32xf32>
    %92 = vector.broadcast %77 : vector<1x32xf32> to vector<8x32xf32>
    %93 = arith.subf %73, %92 : vector<8x32xf32>
    %94 = vector.broadcast %91 : vector<1x32xf32> to vector<8x32xf32>
    %95 = arith.mulf %93, %94 : vector<8x32xf32>
    %96 = vector.extract_strided_slice %86 {offsets = [1, 0], sizes = [1, 32], strides = [1, 1]} : vector<2x32xf32> to vector<1x32xf32>
    %97 = vector.broadcast %96 : vector<1x32xf32> to vector<8x32xf32>
    %98 = arith.addf %95, %97 : vector<8x32xf32>
    %cst_39 = arith.constant 0.000000e+00 : f32
    %99 = vector.broadcast %cst_39 : f32 to vector<8x32xf32>
    %100 = arith.maximumf %98, %99 : vector<8x32xf32>
    %c3 = arith.constant 3 : index
    %c0_40 = arith.constant 0 : index
    %c0_41 = arith.constant 0 : index
    %101 = vector.load %arg1[%c3, %c0_40, %c0_41] : memref<7x32x32xf32, #tpu.memory_space<vmem>>, vector<1x32x32xf32>
    %102 = vector.shape_cast %101 : vector<1x32x32xf32> to vector<32x32xf32>
    %cst_42 = arith.constant dense<0.000000e+00> : vector<8x32xf32>
    %103 = tpu.matmul %100, %102, %cst_42 {dimension_numbers = #tpu.dot_dimension_numbers<[1], [0], [0], [1], [0, 0, 1, 1], [], []>} : vector<8x32xf32>, vector<32x32xf32>, vector<8x32xf32> -> vector<8x32xf32>
    %cst_43 = arith.constant dense<0.000000e+00> : vector<32xf32>
    %104 = vector.multi_reduction <add>, %103, %cst_43 [0] : vector<8x32xf32> to vector<32xf32>
    %105 = vector.shape_cast %104 : vector<32xf32> to vector<1x32xf32>
    %cst_44 = arith.constant 1.250000e-01 : f32
    %106 = vector.broadcast %cst_44 : f32 to vector<1x32xf32>
    %107 = arith.mulf %105, %106 : vector<1x32xf32>
    %108 = arith.mulf %103, %103 : vector<8x32xf32>
    %cst_45 = arith.constant dense<0.000000e+00> : vector<32xf32>
    %109 = vector.multi_reduction <add>, %108, %cst_45 [0] : vector<8x32xf32> to vector<32xf32>
    %110 = vector.shape_cast %109 : vector<32xf32> to vector<1x32xf32>
    %cst_46 = arith.constant 1.250000e-01 : f32
    %111 = vector.broadcast %cst_46 : f32 to vector<1x32xf32>
    %112 = arith.mulf %110, %111 : vector<1x32xf32>
    %113 = arith.mulf %107, %107 : vector<1x32xf32>
    %114 = arith.subf %112, %113 : vector<1x32xf32>
    %c3_47 = arith.constant 3 : index
    %c0_48 = arith.constant 0 : index
    %c0_49 = arith.constant 0 : index
    %115 = vector.load %arg2[%c3_47, %c0_48, %c0_49] : memref<7x2x32xf32, #tpu.memory_space<vmem>>, vector<1x2x32xf32>
    %116 = vector.shape_cast %115 : vector<1x2x32xf32> to vector<2x32xf32>
    %117 = vector.extract_strided_slice %116 {offsets = [0, 0], sizes = [1, 32], strides = [1, 1]} : vector<2x32xf32> to vector<1x32xf32>
    %cst_50 = arith.constant 9.99999974E-6 : f32
    %118 = vector.broadcast %cst_50 : f32 to vector<1x32xf32>
    %119 = arith.addf %114, %118 : vector<1x32xf32>
    %120 = math.rsqrt %119 : vector<1x32xf32>
    %121 = arith.mulf %117, %120 : vector<1x32xf32>
    %122 = vector.broadcast %107 : vector<1x32xf32> to vector<8x32xf32>
    %123 = arith.subf %103, %122 : vector<8x32xf32>
    %124 = vector.broadcast %121 : vector<1x32xf32> to vector<8x32xf32>
    %125 = arith.mulf %123, %124 : vector<8x32xf32>
    %126 = vector.extract_strided_slice %116 {offsets = [1, 0], sizes = [1, 32], strides = [1, 1]} : vector<2x32xf32> to vector<1x32xf32>
    %127 = vector.broadcast %126 : vector<1x32xf32> to vector<8x32xf32>
    %128 = arith.addf %125, %127 : vector<8x32xf32>
    %cst_51 = arith.constant 0.000000e+00 : f32
    %129 = vector.broadcast %cst_51 : f32 to vector<8x32xf32>
    %130 = arith.maximumf %128, %129 : vector<8x32xf32>
    %c4 = arith.constant 4 : index
    %c0_52 = arith.constant 0 : index
    %c0_53 = arith.constant 0 : index
    %131 = vector.load %arg1[%c4, %c0_52, %c0_53] : memref<7x32x32xf32, #tpu.memory_space<vmem>>, vector<1x32x32xf32>
    %132 = vector.shape_cast %131 : vector<1x32x32xf32> to vector<32x32xf32>
    %cst_54 = arith.constant dense<0.000000e+00> : vector<8x32xf32>
    %133 = tpu.matmul %130, %132, %cst_54 {dimension_numbers = #tpu.dot_dimension_numbers<[1], [0], [0], [1], [0, 0, 1, 1], [], []>} : vector<8x32xf32>, vector<32x32xf32>, vector<8x32xf32> -> vector<8x32xf32>
    %cst_55 = arith.constant dense<0.000000e+00> : vector<32xf32>
    %134 = vector.multi_reduction <add>, %133, %cst_55 [0] : vector<8x32xf32> to vector<32xf32>
    %135 = vector.shape_cast %134 : vector<32xf32> to vector<1x32xf32>
    %cst_56 = arith.constant 1.250000e-01 : f32
    %136 = vector.broadcast %cst_56 : f32 to vector<1x32xf32>
    %137 = arith.mulf %135, %136 : vector<1x32xf32>
    %138 = arith.mulf %133, %133 : vector<8x32xf32>
    %cst_57 = arith.constant dense<0.000000e+00> : vector<32xf32>
    %139 = vector.multi_reduction <add>, %138, %cst_57 [0] : vector<8x32xf32> to vector<32xf32>
    %140 = vector.shape_cast %139 : vector<32xf32> to vector<1x32xf32>
    %cst_58 = arith.constant 1.250000e-01 : f32
    %141 = vector.broadcast %cst_58 : f32 to vector<1x32xf32>
    %142 = arith.mulf %140, %141 : vector<1x32xf32>
    %143 = arith.mulf %137, %137 : vector<1x32xf32>
    %144 = arith.subf %142, %143 : vector<1x32xf32>
    %c4_59 = arith.constant 4 : index
    %c0_60 = arith.constant 0 : index
    %c0_61 = arith.constant 0 : index
    %145 = vector.load %arg2[%c4_59, %c0_60, %c0_61] : memref<7x2x32xf32, #tpu.memory_space<vmem>>, vector<1x2x32xf32>
    %146 = vector.shape_cast %145 : vector<1x2x32xf32> to vector<2x32xf32>
    %147 = vector.extract_strided_slice %146 {offsets = [0, 0], sizes = [1, 32], strides = [1, 1]} : vector<2x32xf32> to vector<1x32xf32>
    %cst_62 = arith.constant 9.99999974E-6 : f32
    %148 = vector.broadcast %cst_62 : f32 to vector<1x32xf32>
    %149 = arith.addf %144, %148 : vector<1x32xf32>
    %150 = math.rsqrt %149 : vector<1x32xf32>
    %151 = arith.mulf %147, %150 : vector<1x32xf32>
    %152 = vector.broadcast %137 : vector<1x32xf32> to vector<8x32xf32>
    %153 = arith.subf %133, %152 : vector<8x32xf32>
    %154 = vector.broadcast %151 : vector<1x32xf32> to vector<8x32xf32>
    %155 = arith.mulf %153, %154 : vector<8x32xf32>
    %156 = vector.extract_strided_slice %146 {offsets = [1, 0], sizes = [1, 32], strides = [1, 1]} : vector<2x32xf32> to vector<1x32xf32>
    %157 = vector.broadcast %156 : vector<1x32xf32> to vector<8x32xf32>
    %158 = arith.addf %155, %157 : vector<8x32xf32>
    %cst_63 = arith.constant 0.000000e+00 : f32
    %159 = vector.broadcast %cst_63 : f32 to vector<8x32xf32>
    %160 = arith.maximumf %158, %159 : vector<8x32xf32>
    %c5 = arith.constant 5 : index
    %c0_64 = arith.constant 0 : index
    %c0_65 = arith.constant 0 : index
    %161 = vector.load %arg1[%c5, %c0_64, %c0_65] : memref<7x32x32xf32, #tpu.memory_space<vmem>>, vector<1x32x32xf32>
    %162 = vector.shape_cast %161 : vector<1x32x32xf32> to vector<32x32xf32>
    %cst_66 = arith.constant dense<0.000000e+00> : vector<8x32xf32>
    %163 = tpu.matmul %160, %162, %cst_66 {dimension_numbers = #tpu.dot_dimension_numbers<[1], [0], [0], [1], [0, 0, 1, 1], [], []>} : vector<8x32xf32>, vector<32x32xf32>, vector<8x32xf32> -> vector<8x32xf32>
    %cst_67 = arith.constant dense<0.000000e+00> : vector<32xf32>
    %164 = vector.multi_reduction <add>, %163, %cst_67 [0] : vector<8x32xf32> to vector<32xf32>
    %165 = vector.shape_cast %164 : vector<32xf32> to vector<1x32xf32>
    %cst_68 = arith.constant 1.250000e-01 : f32
    %166 = vector.broadcast %cst_68 : f32 to vector<1x32xf32>
    %167 = arith.mulf %165, %166 : vector<1x32xf32>
    %168 = arith.mulf %163, %163 : vector<8x32xf32>
    %cst_69 = arith.constant dense<0.000000e+00> : vector<32xf32>
    %169 = vector.multi_reduction <add>, %168, %cst_69 [0] : vector<8x32xf32> to vector<32xf32>
    %170 = vector.shape_cast %169 : vector<32xf32> to vector<1x32xf32>
    %cst_70 = arith.constant 1.250000e-01 : f32
    %171 = vector.broadcast %cst_70 : f32 to vector<1x32xf32>
    %172 = arith.mulf %170, %171 : vector<1x32xf32>
    %173 = arith.mulf %167, %167 : vector<1x32xf32>
    %174 = arith.subf %172, %173 : vector<1x32xf32>
    %c5_71 = arith.constant 5 : index
    %c0_72 = arith.constant 0 : index
    %c0_73 = arith.constant 0 : index
    %175 = vector.load %arg2[%c5_71, %c0_72, %c0_73] : memref<7x2x32xf32, #tpu.memory_space<vmem>>, vector<1x2x32xf32>
    %176 = vector.shape_cast %175 : vector<1x2x32xf32> to vector<2x32xf32>
    %177 = vector.extract_strided_slice %176 {offsets = [0, 0], sizes = [1, 32], strides = [1, 1]} : vector<2x32xf32> to vector<1x32xf32>
    %cst_74 = arith.constant 9.99999974E-6 : f32
    %178 = vector.broadcast %cst_74 : f32 to vector<1x32xf32>
    %179 = arith.addf %174, %178 : vector<1x32xf32>
    %180 = math.rsqrt %179 : vector<1x32xf32>
    %181 = arith.mulf %177, %180 : vector<1x32xf32>
    %182 = vector.broadcast %167 : vector<1x32xf32> to vector<8x32xf32>
    %183 = arith.subf %163, %182 : vector<8x32xf32>
    %184 = vector.broadcast %181 : vector<1x32xf32> to vector<8x32xf32>
    %185 = arith.mulf %183, %184 : vector<8x32xf32>
    %186 = vector.extract_strided_slice %176 {offsets = [1, 0], sizes = [1, 32], strides = [1, 1]} : vector<2x32xf32> to vector<1x32xf32>
    %187 = vector.broadcast %186 : vector<1x32xf32> to vector<8x32xf32>
    %188 = arith.addf %185, %187 : vector<8x32xf32>
    %cst_75 = arith.constant 0.000000e+00 : f32
    %189 = vector.broadcast %cst_75 : f32 to vector<8x32xf32>
    %190 = arith.maximumf %188, %189 : vector<8x32xf32>
    %c6 = arith.constant 6 : index
    %c0_76 = arith.constant 0 : index
    %c0_77 = arith.constant 0 : index
    %191 = vector.load %arg1[%c6, %c0_76, %c0_77] : memref<7x32x32xf32, #tpu.memory_space<vmem>>, vector<1x32x32xf32>
    %192 = vector.shape_cast %191 : vector<1x32x32xf32> to vector<32x32xf32>
    %cst_78 = arith.constant dense<0.000000e+00> : vector<8x32xf32>
    %193 = tpu.matmul %190, %192, %cst_78 {dimension_numbers = #tpu.dot_dimension_numbers<[1], [0], [0], [1], [0, 0, 1, 1], [], []>} : vector<8x32xf32>, vector<32x32xf32>, vector<8x32xf32> -> vector<8x32xf32>
    %cst_79 = arith.constant dense<0.000000e+00> : vector<32xf32>
    %194 = vector.multi_reduction <add>, %193, %cst_79 [0] : vector<8x32xf32> to vector<32xf32>
    %195 = vector.shape_cast %194 : vector<32xf32> to vector<1x32xf32>
    %cst_80 = arith.constant 1.250000e-01 : f32
    %196 = vector.broadcast %cst_80 : f32 to vector<1x32xf32>
    %197 = arith.mulf %195, %196 : vector<1x32xf32>
    %198 = arith.mulf %193, %193 : vector<8x32xf32>
    %cst_81 = arith.constant dense<0.000000e+00> : vector<32xf32>
    %199 = vector.multi_reduction <add>, %198, %cst_81 [0] : vector<8x32xf32> to vector<32xf32>
    %200 = vector.shape_cast %199 : vector<32xf32> to vector<1x32xf32>
    %cst_82 = arith.constant 1.250000e-01 : f32
    %201 = vector.broadcast %cst_82 : f32 to vector<1x32xf32>
    %202 = arith.mulf %200, %201 : vector<1x32xf32>
    %203 = arith.mulf %197, %197 : vector<1x32xf32>
    %204 = arith.subf %202, %203 : vector<1x32xf32>
    %c6_83 = arith.constant 6 : index
    %c0_84 = arith.constant 0 : index
    %c0_85 = arith.constant 0 : index
    %205 = vector.load %arg2[%c6_83, %c0_84, %c0_85] : memref<7x2x32xf32, #tpu.memory_space<vmem>>, vector<1x2x32xf32>
    %206 = vector.shape_cast %205 : vector<1x2x32xf32> to vector<2x32xf32>
    %207 = vector.extract_strided_slice %206 {offsets = [0, 0], sizes = [1, 32], strides = [1, 1]} : vector<2x32xf32> to vector<1x32xf32>
    %cst_86 = arith.constant 9.99999974E-6 : f32
    %208 = vector.broadcast %cst_86 : f32 to vector<1x32xf32>
    %209 = arith.addf %204, %208 : vector<1x32xf32>
    %210 = math.rsqrt %209 : vector<1x32xf32>
    %211 = arith.mulf %207, %210 : vector<1x32xf32>
    %212 = vector.broadcast %197 : vector<1x32xf32> to vector<8x32xf32>
    %213 = arith.subf %193, %212 : vector<8x32xf32>
    %214 = vector.broadcast %211 : vector<1x32xf32> to vector<8x32xf32>
    %215 = arith.mulf %213, %214 : vector<8x32xf32>
    %216 = vector.extract_strided_slice %206 {offsets = [1, 0], sizes = [1, 32], strides = [1, 1]} : vector<2x32xf32> to vector<1x32xf32>
    %217 = vector.broadcast %216 : vector<1x32xf32> to vector<8x32xf32>
    %218 = arith.addf %215, %217 : vector<8x32xf32>
    %c0_87 = arith.constant 0 : index
    %c0_88 = arith.constant 0 : index
    %219 = vector.load %arg3[%c0_87, %c0_88] : memref<8x32xf32, #tpu.memory_space<vmem>>, vector<8x32xf32>
    tpu.vector_store %arg3[%c0_87, %c0_88], %218 {strides = array<i32>} : memref<8x32xf32, #tpu.memory_space<vmem>>, vector<8x32xf32>,
    return
  }
}

</mosaic_0001>

<bundles_post_ra>
// kernel: tpu_custom_call.1
= control target key start
LH: loop header
LB: loop body
LE: loop exit
PB: predicated region body
PF: predicated region fallthrough
CT: control target
= control target key end

     0   :  { %8 = vsyncpa [#allocation3], 0  ;;  %s1307_s0 = inlined_call_operand.hbm [shape: f32[8,32], index: 0, kind: input, shape index: {}]   ;;  %s1308_s1 = inlined_call_operand.hbm [shape: f32[7,32,32], index: 1, kind: input, shape index: {}]   ;;  %s1309_s2 = inlined_call_operand.hbm [shape: f32[7,2,32], index: 2, kind: input, shape index: {}]   ;;  %s1310_s3 = inlined_call_operand.hbm [shape: f32[8,32], index: 3, kind: output, shape index: {}]  }
   0x1   :  { %9 = vsyncpa [#allocation6], 0 }
   0x2   :  { %10 = vsyncpa [#allocation4], 0  ;;  %s1159_s12 = smov [#allocation5]   ;;  %s1065_s16 = scalar_lea.hbm %s1308_s1, 3584 }
   0x3   :  { %s26_s13 = sshll.u32 %s1159_s12, 4  ;;  %p1066_p0 = scmp.ne.s32.totalorder %s1308_s1, %s1065_s16  ;;  %s27_s13 = int_to_ptr.vmem [resolvable:$true] %s26_s13 }
   0x4   :  { %p1069_p1 = scmp.lt.u32.totalorder %s1065_s16, %s1308_s1 }
   0x6   :  { %p1071_p2 = pnand %p1069_p1, %p1066_p0 }
   0x8   :  { %1074 = shalt.err (!%p1071_p2)
}
   0x9   :  { %s1075_s21 = scalar_lea.vmem %s27_s13, 3584  ;;  %p1080_p4 = scmp.lt.s32.totalorder %s27_s13, %s27_s13 }
   0xa   :  { %p1076_p3 = scmp.ne.s32.totalorder %s27_s13, %s1075_s21  ;;  %p1081_p5 = scmp.lt.s32.totalorder %s1075_s21, %s1075_s21 }
   0xc   :  { %p1082_p6 = por %p1081_p5, %p1080_p4 }
   0xe   :  { %p1083_p7 = pnand %p1082_p6, %p1076_p3 }
  0x10   :  { %1086 = shalt.err (!%p1083_p7)
}
  0x11   :  { %s1160_s22 = smov 128   ;;  %s1161_s23 = smov 8  }
  0x12   :  { %32 = dma.hbm_to_vmem [thread:$0]  %s1308_s1, 3584, %s27_s13, [#allocation6], %s1160_s22, %s1160_s22, %s1161_s23  }
  0x13   :  { %s1162_s26 = smov [#allocation2]   ;;  %s1163_s28 = smov [#allocation7]  }
  0x14   :  { %s17_s27 = sshll.u32 %s1162_s26, 4  ;;  %s38_s29 = sshll.u32 %s1163_s28, 4  ;;  %s18_s27 = int_to_ptr.vmem [resolvable:$true] %s17_s27  ;;  %s39_s29 = int_to_ptr.vmem [resolvable:$true] %s38_s29 }
  0x15   :  { %s1087_s5 = scalar_lea.hbm %s1307_s0, 128 }
  0x16   :  { %p1088_p8 = scmp.ne.s32.totalorder %s1307_s0, %s1087_s5  ;;  %p1091_p9 = scmp.lt.u32.totalorder %s1087_s5, %s1307_s0 }
  0x18   :  { %p1093_p10 = pnand %p1091_p9, %p1088_p8 }
  0x1a   :  { %1096 = shalt.err (!%p1093_p10)
}
  0x1b   :  { %s1097_s1 = scalar_lea.vmem %s18_s27, 128  ;;  %p1102_p12 = scmp.lt.s32.totalorder %s18_s27, %s18_s27 }
  0x1c   :  { %p1098_p11 = scmp.ne.s32.totalorder %s18_s27, %s1097_s1  ;;  %p1103_p13 = scmp.lt.s32.totalorder %s1097_s1, %s1097_s1 }
  0x1e   :  { %p1104_p0 = por %p1103_p13, %p1102_p12 }
  0x20   :  { %p1105_p1 = pnand %p1104_p0, %p1098_p11 }
  0x22   :  { %1108 = shalt.err (!%p1105_p1)
}
  0x23   :  { %20 = dma.hbm_to_vmem [thread:$0]  %s1307_s0, 128, %s18_s27, [#allocation3]  }
  0x24   :  { %s1109_s14 = scalar_lea.hbm %s1309_s2, 224 }
  0x25   :  { %p1110_p2 = scmp.ne.s32.totalorder %s1309_s2, %s1109_s14  ;;  %p1113_p3 = scmp.lt.u32.totalorder %s1109_s14, %s1309_s2 }
  0x27   :  { %p1115_p4 = pnand %p1113_p3, %p1110_p2 }
  0x29   :  { %1118 = shalt.err (!%p1115_p4)
}
  0x2a   :  { %s1119_s19 = scalar_lea.vmem %s39_s29, 224  ;;  %p1124_p6 = scmp.lt.s32.totalorder %s39_s29, %s39_s29 }
  0x2b   :  { %p1120_p5 = scmp.ne.s32.totalorder %s39_s29, %s1119_s19  ;;  %p1125_p7 = scmp.lt.s32.totalorder %s1119_s19, %s1119_s19 }
  0x2d   :  { %p1126_p8 = por %p1125_p7, %p1124_p6 }
  0x2f   :  { %p1127_p9 = pnand %p1126_p8, %p1120_p5 }
  0x31   :  { %1130 = shalt.err (!%p1127_p9)
}
  0x32   :  { %s1164_s0 = smov 32   ;;  %s1165_s20 = smov 2  }
  0x33   :  { %44 = dma.hbm_to_vmem [thread:$0]  %s1309_s2, 224, %s39_s29, [#allocation6], %s1164_s0, %s1164_s0, %s1165_s20  }
  0x34   :  { %1153 = dma.done.wait [#allocation3], 128  }
  0x35   :  { %1154 = vsyncadd [#allocation3], 4294967168 }
  0x36   :  { %1155 = dma.done.wait [#allocation6], 3808  }
  0x37   :  { %1156 = vsyncadd [#allocation6], 4294963488  ;;  %v54_v0 = vld [vmem:[#allocation2] sm:$0xff]  ;;  %vm56_vm0 = vcmask 261120   ;;  %v65_v3 = vld [vmem:[#allocation5] sm:$0xff]  ;;  %v1166_v6 = vmov 0.0|0.0   ;;  %v166_v44 = vlaneseq }
  0x38   :  { %v55_v1 = vmul.f32 %v54_v0, %v54_v0  ;;  %v66_v4 = vld [vmem:[#allocation5 + $0x8] sm:$0xff]  ;;  %v67_v5 = vld [vmem:[#allocation5 + $0x10] sm:$0xff]  ;;  %996 = vmatprep.subr.bf16.mxu0 %v1166_v6  ;;  %v68_v8 = vld [vmem:[#allocation5 + $0x18] sm:$0xff]  ;;  %vm1167_vm1 = vmmov 0   ;;  %v1168_v9 = vmov 0.0   ;;  %1002 = vmatprep.subr.bf16.mxu1 %v1166_v6  ;;  %s1169_s2 = smov [#allocation8]  }
  0x39   :  { %v997_v7 = vpack.c.bf16 %v66_v4, %v65_v3  ;;  %927 = vmatprep.mubr.msk.f32.mxu0 %vm1167_vm1, %v1168_v9  ;;  %938 = vmatprep.mubr.msk.f32.mxu1 %vm1167_vm1, %v1168_v9  ;;  %v1000_v10 = vpack.c.bf16 %v68_v8, %v67_v5  ;;  %v178_v16 = vld [vmem:[#allocation5 + $0x20] sm:$0xff]  ;;  %v179_v17 = vld [vmem:[#allocation5 + $0x28] sm:$0xff]  ;;  %v180_v19 = vld [vmem:[#allocation5 + $0x30] sm:$0xff]  ;;  %v167_v45 = vshrl.u32 %v166_v44, 7  ;;  %s867_s23 = sshll.u32 %s1169_s2, 4  ;;  %s868_s23 = int_to_ptr.vmem [resolvable:$true] %s867_s23 }
  0x3a   :  { %v57_v2 = vsel %vm56_vm0, %v55_v1, 0.0  ;;  %v1003_v18 = vpack.c.bf16 %v179_v17, %v178_v16  ;;  %v181_v20 = vld [vmem:[#allocation5 + $0x38] sm:$0xff]  ;;  %v161_v46 = vld [vmem:[#allocation7] sm:$0x3]  ;;  %v293_v58 = vld [vmem:[#allocation5 + $0x48] sm:$0xff]  ;;  %s1131_s24 = scalar_lea.vmem %s868_s23, 128  ;;  %p1136_p11 = scmp.lt.s32.totalorder %s868_s23, %s868_s23 }
  0x3b   :  { %58 = vadd.xlane.f32.xlu0 %v57_v2  ;;  %998 = vmatpush3.bf16.msra.mxu0 %v997_v7  ;;  %v1006_v21 = vpack.c.bf16 %v181_v20, %v180_v19  ;;  %v1242_v47 = vsub.s32 0, %v167_v45  ;;  %v1244_v48 = vsub.s32 1, %v167_v45  ;;  %v292_v57 = vld [vmem:[#allocation5 + $0x40] sm:$0xff]  ;;  %v294_v60 = vld [vmem:[#allocation5 + $0x50] sm:$0xff]  ;;  %v295_v61 = vld [vmem:[#allocation5 + $0x58] sm:$0xff]  ;;  %p1132_p10 = scmp.ne.s32.totalorder %s868_s23, %s1131_s24  ;;  %p1137_p12 = scmp.lt.s32.totalorder %s1131_s24, %s1131_s24 }
  0x3c   :  { %999 = vmatprep.subr.bf16.mxu0 %v1166_v6  ;;  %1004 = vmatpush3.bf16.msra.mxu1 %v1003_v18  ;;  %v1009_v59 = vpack.c.bf16 %v293_v58, %v292_v57  ;;  %v1012_v62 = vpack.c.bf16 %v295_v61, %v294_v60 }
  0x3d   :  { %1005 = vmatprep.subr.bf16.mxu1 %v1166_v6  ;;  %v174_v53 = vrot.slane %v161_v46, %v1244_v48  ;;  %p1138_p13 = por %p1137_p12, %p1136_p11 }
  0x3f   :  { %1001 = vmatpush3.bf16.msra.mxu0 %v1000_v10  ;;  %p1139_p0 = pnand %p1138_p13, %p1132_p10 }
  0x40   :  { %1008 = vmatprep.subr.bf16.mxu0 %v1166_v6  ;;  %1007 = vmatpush3.bf16.msra.mxu1 %v1006_v21 }
  0x41   :  { %1014 = vmatprep.subr.bf16.mxu1 %v1166_v6 }
  0xc8   :  { %v59_v11 = vpop.xlane.xlu0 %58 }
  0xc9   :  { %v61_v12 = vmul.f32 0.03125, %v59_v11 }
  0xcb   :  { %v62_v13 = vadd.f32 1e-08, %v61_v12 }
  0xcd   :  { %1049 = vrsqrt.f32 %v62_v13 }
  0xd7   :  { %v1050_v14 = vpop.eup %1049 }
  0xd8   :  { %v64_v15 = vmul.f32 %v1050_v14, %v54_v0 }
  0xda   :  { %928 = vmatmul.mubr.msk.f32.vlgmr.msra.gmra.mrb[0].mxu0 %vm56_vm0, %v64_v15 }
  0xdb   :  { %949 = vmatprep.mubr.msk.f32.mxu0 %vm1167_vm1, %v1168_v9  ;;  %1010 = vmatpush3.bf16.msra.mxu0 %v1009_v59 }
  0xdc   :  { %1011 = vmatprep.subr.bf16.mxu0 %v1166_v6 }
  0xdf   :  { %1013 = vmatpush3.bf16.msra.mxu0 %v1012_v62  ;;  %v389_v62 = vld [vmem:[#allocation7 + $0x4] sm:$0x3] }
  0xe0   :  { %1020 = vmatprep.subr.bf16.mxu0 %v1166_v6 }
 0x1ad   :  { %v138_v22 = vpop.f32.mrb[0].mxu0 }
 0x1ae   :  { %v142_v23 = vsel %vm56_vm0, %v138_v22, 0.0  ;;  %v150_v24 = vmul.f32 %v138_v22, %v138_v22  ;;  %v929_v25 = vpop.f32.mrb[1].mxu0 }
 0x1af   :  { %v143_v26 = vrot.slane %v142_v23, 4 }
 0x1b0   :  { %v151_v27 = vsel %vm56_vm0, %v150_v24, 0.0 }
 0x1b1   :  { %v144_v28 = vadd.f32 %v143_v26, %v142_v23  ;;  %v152_v29 = vrot.slane %v151_v27, 4  ;;  %v275_v23 = vld [vmem:[#allocation7 + $0x2] sm:$0x3] }
 0x1b3   :  { %v145_v30 = vrot.slane %v144_v28, 2  ;;  %v153_v31 = vadd.f32 %v152_v29, %v151_v27 }
 0x1b5   :  { %v146_v32 = vadd.f32 %v145_v30, %v144_v28  ;;  %v154_v33 = vrot.slane %v153_v31, 2  ;;  %v288_v28 = vrot.slane %v275_v23, %v1244_v48 }
 0x1b7   :  { %v147_v34 = vrot.slane %v146_v32, 1  ;;  %v155_v35 = vadd.f32 %v154_v33, %v153_v31  ;;  %v407_v33 = vld [vmem:[#allocation5 + $0x68] sm:$0xff] }
 0x1b9   :  { %v148_v36 = vadd.f32 %v147_v34, %v146_v32  ;;  %v156_v37 = vrot.slane %v155_v35, 1  ;;  %v406_v32 = vld [vmem:[#allocation5 + $0x60] sm:$0xff] }
 0x1ba   :  { %v1015_v34 = vpack.c.bf16 %v407_v33, %v406_v32 }
 0x1bb   :  { %v149_v38 = vmul.f32 0.125, %v148_v36  ;;  %v157_v39 = vadd.f32 %v156_v37, %v155_v35  ;;  %v408_v35 = vld [vmem:[#allocation5 + $0x70] sm:$0xff]  ;;  %v409_v36 = vld [vmem:[#allocation5 + $0x78] sm:$0xff] }
 0x1bc   :  { %v1018_v37 = vpack.c.bf16 %v409_v36, %v408_v35 }
 0x1bd   :  { %v158_v40 = vmul.f32 0.125, %v157_v39  ;;  %v159_v41 = vmul.f32 %v149_v38, %v149_v38  ;;  %v165_v51 = vsub.f32 %v138_v22, %v149_v38 }
 0x1bf   :  { %v160_v42 = vsub.f32 %v158_v40, %v159_v41 }
 0x1c1   :  { %v162_v43 = vadd.f32 1e-05, %v160_v42 }
 0x1c3   :  { %1051 = vrsqrt.f32 %v162_v43 }
 0x1cd   :  { %v1052_v49 = vpop.eup %1051 }
 0x1ce   :  { %v164_v50 = vmul.f32 %v1052_v49, %v161_v46 }
 0x1d0   :  { %v169_v52 = vrot.slane %v164_v50, %v1242_v47 }
 0x1d2   :  { %v170_v54 = vmul.f32 %v169_v52, %v165_v51 }
 0x1d4   :  { %v175_v55 = vadd.f32 %v174_v53, %v170_v54 }
 0x1d6   :  { %v176_v56 = vmax.f32 %v175_v55, 0.0 }
 0x1d8   :  { %939 = vmatmul.mubr.msk.f32.vlgmr.msra.gmra.mrb[0].mxu1 %vm56_vm0, %v176_v56 }
 0x1d9   :  { %960 = vmatprep.mubr.msk.f32.mxu1 %vm1167_vm1, %v1168_v9  ;;  %1016 = vmatpush3.bf16.msra.mxu1 %v1015_v34 }
 0x1da   :  { %1017 = vmatprep.subr.bf16.mxu1 %v1166_v6 }
 0x1dd   :  { %1019 = vmatpush3.bf16.msra.mxu1 %v1018_v37  ;;  %v503_v37 = vld [vmem:[#allocation7 + $0x6] sm:$0x3] }
 0x1de   :  { %1026 = vmatprep.subr.bf16.mxu1 %v1166_v6 }
 0x2ab   :  { %v251_v63 = vpop.f32.mrb[0].mxu1 }
 0x2ac   :  { %v255_v0 = vsel %vm56_vm0, %v251_v63, 0.0  ;;  %v263_v1 = vmul.f32 %v251_v63, %v251_v63  ;;  %v940_v2 = vpop.f32.mrb[1].mxu1 }
 0x2ad   :  { %v256_v3 = vrot.slane %v255_v0, 4 }
 0x2ae   :  { %v264_v4 = vsel %vm56_vm0, %v263_v1, 0.0 }
 0x2af   :  { %v257_v5 = vadd.f32 %v256_v3, %v255_v0  ;;  %v265_v7 = vrot.slane %v264_v4, 4  ;;  %v402_v3 = vrot.slane %v389_v62, %v1244_v48 }
 0x2b1   :  { %v258_v8 = vrot.slane %v257_v5, 2  ;;  %v266_v10 = vadd.f32 %v265_v7, %v264_v4 }
 0x2b3   :  { %v259_v11 = vadd.f32 %v258_v8, %v257_v5  ;;  %v267_v12 = vrot.slane %v266_v10, 2  ;;  %v520_v8 = vld [vmem:[#allocation5 + $0x80] sm:$0xff] }
 0x2b5   :  { %v260_v13 = vrot.slane %v259_v11, 1  ;;  %v268_v14 = vadd.f32 %v267_v12, %v266_v10  ;;  %v521_v10 = vld [vmem:[#allocation5 + $0x88] sm:$0xff]  ;;  %v522_v12 = vld [vmem:[#allocation5 + $0x90] sm:$0xff] }
 0x2b7   :  { %v261_v15 = vadd.f32 %v260_v13, %v259_v11  ;;  %v269_v16 = vrot.slane %v268_v14, 1  ;;  %v1021_v11 = vpack.c.bf16 %v521_v10, %v520_v8  ;;  %v523_v13 = vld [vmem:[#allocation5 + $0x98] sm:$0xff] }
 0x2b9   :  { %v262_v17 = vmul.f32 0.125, %v261_v15  ;;  %v270_v18 = vadd.f32 %v269_v16, %v268_v14  ;;  %v1024_v14 = vpack.c.bf16 %v523_v13, %v522_v12  ;;  %v617_v13 = vld [vmem:[#allocation7 + $0x8] sm:$0x3] }
 0x2bb   :  { %v271_v19 = vmul.f32 0.125, %v270_v18  ;;  %v272_v20 = vmul.f32 %v262_v17, %v262_v17  ;;  %v279_v26 = vsub.f32 %v251_v63, %v262_v17 }
 0x2bd   :  { %v273_v21 = vsub.f32 %v271_v19, %v272_v20 }
 0x2bf   :  { %v276_v22 = vadd.f32 1e-05, %v273_v21 }
 0x2c1   :  { %1053 = vrsqrt.f32 %v276_v22 }
 0x2cb   :  { %v1054_v24 = vpop.eup %1053 }
 0x2cc   :  { %v278_v25 = vmul.f32 %v1054_v24, %v275_v23 }
 0x2ce   :  { %v283_v27 = vrot.slane %v278_v25, %v1242_v47 }
 0x2d0   :  { %v284_v29 = vmul.f32 %v283_v27, %v279_v26 }
 0x2d2   :  { %v289_v30 = vadd.f32 %v288_v28, %v284_v29 }
 0x2d4   :  { %v290_v31 = vmax.f32 %v289_v30, 0.0 }
 0x2d6   :  { %950 = vmatmul.mubr.msk.f32.vlgmr.msra.gmra.mrb[2].mxu0 %vm56_vm0, %v290_v31 }
 0x2d7   :  { %971 = vmatprep.mubr.msk.f32.mxu0 %vm1167_vm1, %v1168_v9  ;;  %1022 = vmatpush3.bf16.msra.mxu0 %v1021_v11 }
 0x2d8   :  { %1023 = vmatprep.subr.bf16.mxu0 %v1166_v6 }
 0x2db   :  { %1025 = vmatpush3.bf16.msra.mxu0 %v1024_v14 }
 0x2dc   :  { %1032 = vmatprep.subr.bf16.mxu0 %v1166_v6 }
 0x3a9   :  { %v365_v38 = vpop.f32.mrb[2].mxu0 }
 0x3aa   :  { %v369_v39 = vsel %vm56_vm0, %v365_v38, 0.0  ;;  %v377_v40 = vmul.f32 %v365_v38, %v365_v38  ;;  %v951_v41 = vpop.f32.mrb[3].mxu0 }
 0x3ab   :  { %v370_v42 = vrot.slane %v369_v39, 4 }
 0x3ac   :  { %v378_v43 = vsel %vm56_vm0, %v377_v40, 0.0 }
 0x3ad   :  { %v371_v44 = vadd.f32 %v370_v42, %v369_v39  ;;  %v379_v45 = vrot.slane %v378_v43, 4  ;;  %v516_v42 = vrot.slane %v503_v37, %v1244_v48 }
 0x3af   :  { %v372_v46 = vrot.slane %v371_v44, 2  ;;  %v380_v49 = vadd.f32 %v379_v45, %v378_v43 }
 0x3b1   :  { %v373_v50 = vadd.f32 %v372_v46, %v371_v44  ;;  %v381_v51 = vrot.slane %v380_v49, 2  ;;  %v634_v46 = vld [vmem:[#allocation5 + $0xa0] sm:$0xff] }
 0x3b3   :  { %v374_v52 = vrot.slane %v373_v50, 1  ;;  %v382_v53 = vadd.f32 %v381_v51, %v380_v49  ;;  %v635_v49 = vld [vmem:[#allocation5 + $0xa8] sm:$0xff]  ;;  %v636_v51 = vld [vmem:[#allocation5 + $0xb0] sm:$0xff] }
 0x3b5   :  { %v375_v54 = vadd.f32 %v374_v52, %v373_v50  ;;  %v383_v55 = vrot.slane %v382_v53, 1  ;;  %v1027_v50 = vpack.c.bf16 %v635_v49, %v634_v46  ;;  %v637_v52 = vld [vmem:[#allocation5 + $0xb8] sm:$0xff] }
 0x3b7   :  { %v376_v56 = vmul.f32 0.125, %v375_v54  ;;  %v384_v57 = vadd.f32 %v383_v55, %v382_v53  ;;  %v1030_v53 = vpack.c.bf16 %v637_v52, %v636_v51  ;;  %v731_v51 = vld [vmem:[#allocation7 + $0xa] sm:$0x3] }
 0x3b9   :  { %v385_v58 = vmul.f32 0.125, %v384_v57  ;;  %v386_v59 = vmul.f32 %v376_v56, %v376_v56  ;;  %v393_v1 = vsub.f32 %v365_v38, %v376_v56 }
 0x3bb   :  { %v387_v60 = vsub.f32 %v385_v58, %v386_v59 }
 0x3bd   :  { %v390_v61 = vadd.f32 1e-05, %v387_v60 }
 0x3bf   :  { %1055 = vrsqrt.f32 %v390_v61 }
 0x3c9   :  { %v1056_v63 = vpop.eup %1055 }
 0x3ca   :  { %v392_v0 = vmul.f32 %v1056_v63, %v389_v62 }
 0x3cc   :  { %v397_v2 = vrot.slane %v392_v0, %v1242_v47 }
 0x3ce   :  { %v398_v4 = vmul.f32 %v397_v2, %v393_v1 }
 0x3d0   :  { %v403_v5 = vadd.f32 %v402_v3, %v398_v4 }
 0x3d2   :  { %v404_v7 = vmax.f32 %v403_v5, 0.0 }
 0x3d4   :  { %961 = vmatmul.mubr.msk.f32.vlgmr.msra.gmra.mrb[2].mxu1 %vm56_vm0, %v404_v7 }
 0x3d5   :  { %982 = vmatprep.mubr.msk.f32.mxu1 %vm1167_vm1, %v1168_v9  ;;  %1028 = vmatpush3.bf16.msra.mxu1 %v1027_v50 }
 0x3d6   :  { %1029 = vmatprep.subr.bf16.mxu1 %v1166_v6 }
 0x3d9   :  { %1031 = vmatpush3.bf16.msra.mxu1 %v1030_v53 }
 0x4a7   :  { %v479_v15 = vpop.f32.mrb[2].mxu1 }
 0x4a8   :  { %v483_v16 = vsel %vm56_vm0, %v479_v15, 0.0  ;;  %v491_v17 = vmul.f32 %v479_v15, %v479_v15  ;;  %v962_v18 = vpop.f32.mrb[3].mxu1 }
 0x4a9   :  { %v484_v19 = vrot.slane %v483_v16, 4  ;;  %v630_v18 = vrot.slane %v617_v13, %v1244_v48 }
 0x4aa   :  { %v492_v20 = vsel %vm56_vm0, %v491_v17, 0.0 }
 0x4ab   :  { %v485_v21 = vadd.f32 %v484_v19, %v483_v16  ;;  %v493_v22 = vrot.slane %v492_v20, 4 }
 0x4ad   :  { %v486_v23 = vrot.slane %v485_v21, 2  ;;  %v494_v24 = vadd.f32 %v493_v22, %v492_v20  ;;  %v748_v22 = vld [vmem:[#allocation5 + $0xc0] sm:$0xff] }
 0x4af   :  { %v487_v25 = vadd.f32 %v486_v23, %v485_v21  ;;  %v495_v26 = vrot.slane %v494_v24, 2  ;;  %v749_v23 = vld [vmem:[#allocation5 + $0xc8] sm:$0xff] }
 0x4b1   :  { %v488_v27 = vrot.slane %v487_v25, 1  ;;  %v496_v28 = vadd.f32 %v495_v26, %v494_v24  ;;  %v1033_v24 = vpack.c.bf16 %v749_v23, %v748_v22  ;;  %v751_v26 = vld [vmem:[#allocation5 + $0xd8] sm:$0xff] }
 0x4b3   :  { %v489_v29 = vadd.f32 %v488_v27, %v487_v25  ;;  %v497_v30 = vrot.slane %v496_v28, 1  ;;  %v750_v25 = vld [vmem:[#allocation5 + $0xd0] sm:$0xff] }
 0x4b4   :  { %v1036_v27 = vpack.c.bf16 %v751_v26, %v750_v25 }
 0x4b5   :  { %v490_v31 = vmul.f32 0.125, %v489_v29  ;;  %v498_v32 = vadd.f32 %v497_v30, %v496_v28 }
 0x4b7   :  { %v499_v33 = vmul.f32 0.125, %v498_v32  ;;  %v500_v34 = vmul.f32 %v490_v31, %v490_v31  ;;  %v507_v40 = vsub.f32 %v479_v15, %v490_v31 }
 0x4b9   :  { %v501_v35 = vsub.f32 %v499_v33, %v500_v34 }
 0x4bb   :  { %v504_v36 = vadd.f32 1e-05, %v501_v35 }
 0x4bd   :  { %1057 = vrsqrt.f32 %v504_v36 }
 0x4c7   :  { %v1058_v38 = vpop.eup %1057 }
 0x4c8   :  { %v506_v39 = vmul.f32 %v1058_v38, %v503_v37 }
 0x4ca   :  { %v511_v41 = vrot.slane %v506_v39, %v1242_v47 }
 0x4cc   :  { %v512_v43 = vmul.f32 %v511_v41, %v507_v40 }
 0x4ce   :  { %v517_v44 = vadd.f32 %v516_v42, %v512_v43 }
 0x4d0   :  { %v518_v45 = vmax.f32 %v517_v44, 0.0 }
 0x4d2   :  { %972 = vmatmul.mubr.msk.f32.vlgmr.msra.gmra.mrb[4].mxu0 %vm56_vm0, %v518_v45 }
 0x4d3   :  { %993 = vmatprep.mubr.msk.f32.mxu0 %vm1167_vm1, %v1168_v9  ;;  %1034 = vmatpush3.bf16.msra.mxu0 %v1033_v24 }
 0x4d4   :  { %1035 = vmatprep.subr.bf16.mxu0 %v1166_v6 }
 0x4d7   :  { %1037 = vmatpush3.bf16.msra.mxu0 %v1036_v27 }
 0x5a5   :  { %v593_v54 = vpop.f32.mrb[4].mxu0 }
 0x5a6   :  { %v597_v55 = vsel %vm56_vm0, %v593_v54, 0.0  ;;  %v605_v56 = vmul.f32 %v593_v54, %v593_v54  ;;  %v973_v57 = vpop.f32.mrb[5].mxu0 }
 0x5a7   :  { %v598_v58 = vrot.slane %v597_v55, 4 }
 0x5a8   :  { %v606_v59 = vsel %vm56_vm0, %v605_v56, 0.0  ;;  %v744_v56 = vrot.slane %v731_v51, %v1244_v48 }
 0x5a9   :  { %v599_v60 = vadd.f32 %v598_v58, %v597_v55  ;;  %v607_v9 = vrot.slane %v606_v59, 4 }
 0x5ab   :  { %v600_v61 = vrot.slane %v599_v60, 2  ;;  %v608_v62 = vadd.f32 %v607_v9, %v606_v59 }
 0x5ad   :  { %v601_v63 = vadd.f32 %v600_v61, %v599_v60  ;;  %v609_v0 = vrot.slane %v608_v62, 2 }
 0x5af   :  { %v602_v1 = vrot.slane %v601_v63, 1  ;;  %v610_v2 = vadd.f32 %v609_v0, %v608_v62 }
 0x5b1   :  { %v603_v3 = vadd.f32 %v602_v1, %v601_v63  ;;  %v611_v4 = vrot.slane %v610_v2, 1 }
 0x5b3   :  { %v604_v5 = vmul.f32 0.125, %v603_v3  ;;  %v612_v7 = vadd.f32 %v611_v4, %v610_v2 }
 0x5b5   :  { %v613_v8 = vmul.f32 0.125, %v612_v7  ;;  %v614_v10 = vmul.f32 %v604_v5, %v604_v5  ;;  %v621_v16 = vsub.f32 %v593_v54, %v604_v5 }
 0x5b7   :  { %v615_v11 = vsub.f32 %v613_v8, %v614_v10 }
 0x5b9   :  { %v618_v12 = vadd.f32 1e-05, %v615_v11 }
 0x5bb   :  { %1059 = vrsqrt.f32 %v618_v12 }
 0x5c5   :  { %v1060_v14 = vpop.eup %1059 }
 0x5c6   :  { %v620_v15 = vmul.f32 %v1060_v14, %v617_v13 }
 0x5c8   :  { %v625_v17 = vrot.slane %v620_v15, %v1242_v47 }
 0x5ca   :  { %v626_v19 = vmul.f32 %v625_v17, %v621_v16 }
 0x5cc   :  { %v631_v20 = vadd.f32 %v630_v18, %v626_v19  ;;  %v845_v19 = vld [vmem:[#allocation7 + $0xc] sm:$0x3] }
 0x5cd   :  { %v858_v24 = vrot.slane %v845_v19, %v1244_v48 }
 0x5ce   :  { %v632_v21 = vmax.f32 %v631_v20, 0.0 }
 0x5d0   :  { %983 = vmatmul.mubr.msk.f32.vlgmr.msra.gmra.mrb[4].mxu1 %vm56_vm0, %v632_v21 }
 0x6a3   :  { %v707_v28 = vpop.f32.mrb[4].mxu1 }
 0x6a4   :  { %v711_v29 = vsel %vm56_vm0, %v707_v28, 0.0  ;;  %v719_v30 = vmul.f32 %v707_v28, %v707_v28  ;;  %v984_v31 = vpop.f32.mrb[5].mxu1 }
 0x6a5   :  { %v712_v32 = vrot.slane %v711_v29, 4 }
 0x6a6   :  { %v720_v33 = vsel %vm56_vm0, %v719_v30, 0.0 }
 0x6a7   :  { %v713_v34 = vadd.f32 %v712_v32, %v711_v29  ;;  %v721_v35 = vrot.slane %v720_v33, 4 }
 0x6a9   :  { %v714_v36 = vrot.slane %v713_v34, 2  ;;  %v722_v37 = vadd.f32 %v721_v35, %v720_v33 }
 0x6ab   :  { %v715_v38 = vadd.f32 %v714_v36, %v713_v34  ;;  %v723_v39 = vrot.slane %v722_v37, 2 }
 0x6ad   :  { %v716_v40 = vrot.slane %v715_v38, 1  ;;  %v724_v6 = vadd.f32 %v723_v39, %v722_v37 }
 0x6af   :  { %v717_v41 = vadd.f32 %v716_v40, %v715_v38  ;;  %v725_v42 = vrot.slane %v724_v6, 1 }
 0x6b1   :  { %v718_v43 = vmul.f32 0.125, %v717_v41  ;;  %v726_v44 = vadd.f32 %v725_v42, %v724_v6 }
 0x6b3   :  { %v727_v45 = vmul.f32 0.125, %v726_v44  ;;  %v728_v46 = vmul.f32 %v718_v43, %v718_v43  ;;  %v735_v54 = vsub.f32 %v707_v28, %v718_v43 }
 0x6b5   :  { %v729_v49 = vsub.f32 %v727_v45, %v728_v46 }
 0x6b7   :  { %v732_v50 = vadd.f32 1e-05, %v729_v49 }
 0x6b9   :  { %1061 = vrsqrt.f32 %v732_v50 }
 0x6c3   :  { %v1062_v52 = vpop.eup %1061 }
 0x6c4   :  { %v734_v53 = vmul.f32 %v1062_v52, %v731_v51 }
 0x6c6   :  { %v739_v55 = vrot.slane %v734_v53, %v1242_v47 }
 0x6c8   :  { %v740_v57 = vmul.f32 %v739_v55, %v735_v54 }
 0x6ca   :  { %v745_v58 = vadd.f32 %v744_v56, %v740_v57 }
 0x6cc   :  { %v746_v59 = vmax.f32 %v745_v58, 0.0 }
 0x6ce   :  { %994 = vmatmul.mubr.msk.f32.vlgmr.msra.gmra.mrb[6].mxu0 %vm56_vm0, %v746_v59 }
 0x7a1   :  { %v821_v60 = vpop.f32.mrb[6].mxu0 }
 0x7a2   :  { %v825_v9 = vsel %vm56_vm0, %v821_v60, 0.0  ;;  %v833_v61 = vmul.f32 %v821_v60, %v821_v60  ;;  %v995_v62 = vpop.f32.mrb[7].mxu0 }
 0x7a3   :  { %v826_v63 = vrot.slane %v825_v9, 4 }
 0x7a4   :  { %v834_v0 = vsel %vm56_vm0, %v833_v61, 0.0 }
 0x7a5   :  { %v827_v1 = vadd.f32 %v826_v63, %v825_v9  ;;  %v835_v2 = vrot.slane %v834_v0, 4 }
 0x7a7   :  { %v828_v3 = vrot.slane %v827_v1, 2  ;;  %v836_v4 = vadd.f32 %v835_v2, %v834_v0 }
 0x7a9   :  { %v829_v5 = vadd.f32 %v828_v3, %v827_v1  ;;  %v837_v7 = vrot.slane %v836_v4, 2 }
 0x7ab   :  { %v830_v8 = vrot.slane %v829_v5, 1  ;;  %v838_v10 = vadd.f32 %v837_v7, %v836_v4 }
 0x7ad   :  { %v831_v11 = vadd.f32 %v830_v8, %v829_v5  ;;  %v839_v12 = vrot.slane %v838_v10, 1 }
 0x7af   :  { %v832_v13 = vmul.f32 0.125, %v831_v11  ;;  %v840_v14 = vadd.f32 %v839_v12, %v838_v10 }
 0x7b1   :  { %v841_v15 = vmul.f32 0.125, %v840_v14  ;;  %v842_v16 = vmul.f32 %v832_v13, %v832_v13  ;;  %v849_v22 = vsub.f32 %v821_v60, %v832_v13 }
 0x7b3   :  { %v843_v17 = vsub.f32 %v841_v15, %v842_v16 }
 0x7b5   :  { %v846_v18 = vadd.f32 1e-05, %v843_v17 }
 0x7b7   :  { %1063 = vrsqrt.f32 %v846_v18 }
 0x7c1   :  { %v1064_v20 = vpop.eup %1063 }
 0x7c2   :  { %v848_v21 = vmul.f32 %v1064_v20, %v845_v19 }
 0x7c4   :  { %v853_v23 = vrot.slane %v848_v21, %v1242_v47 }
 0x7c6   :  { %v854_v25 = vmul.f32 %v853_v23, %v849_v22 }
 0x7c8   :  { %v859_v26 = vadd.f32 %v858_v24, %v854_v25 }
 0x7ca   :  { %860 = vst.msk [vmem:[#allocation8] sm:$0xff] %vm56_vm0, %v859_v26 }
 0x7cb   :  { %1142 = shalt.err (!%p1139_p0)
}
 0x7cc   :  { %s1143_s27 = scalar_lea.hbm %s1310_s3, 128 }
 0x7cd   :  { %p1144_p1 = scmp.ne.s32.totalorder %s1310_s3, %s1143_s27  ;;  %p1147_p2 = scmp.lt.u32.totalorder %s1143_s27, %s1310_s3 }
 0x7cf   :  { %p1149_p3 = pnand %p1147_p2, %p1144_p1 }
 0x7d1   :  { %1152 = shalt.err (!%p1149_p3)
}
 0x7d2   :  { %870 = dma.vmem_to_hbm [thread:$0]  %s868_s23, 128, %s1310_s3, [#allocation4]  }
 0x7d3   :  { %1157 = dma.done.wait [#allocation4], 128  }
 0x7d4   :  { %1158 = vsyncadd [#allocation4], 4294967168 }
 0x7d5   :  { %874 = vsyncpa [#allocation3], 1 }
 0x7d6   :  { %875 = vsyncpa [#allocation6], 1 }
 0x7d7   :  { %876 = vsyncpa [#allocation4], 1 }

</bundles_post_ra>
